<compile_context>
chip_gen: v5e
topology: v5e:2x2
jax: 0.10.0
libtpu: 0.0.40
codegen_flags: <defaults>
</compile_context>

<pallas_src>
import math

import jax
import jax.numpy as jnp
from jax.experimental import pallas as pl
from jax.experimental.pallas import tpu as pltpu

_LANES = 128        # vreg lane width
_SUBLANES = 8       # vreg sublane height (32-bit)

# Working-set budget for all double-buffered streams.  24 MiB fits v6e/v7x's
# 32 MiB scoped-VMEM default; we also raise vmem_limit_bytes explicitly so the
# same sizing works on v5e (16 MiB scoped default, 128 MiB physical).
_VMEM_BUDGET = 24 * 1024 * 1024
_VMEM_LIMIT = 32 * 1024 * 1024
# Per-stream block ceiling: ~1-2 MiB blocks reach ~85% of HBM roofline and
# keep the ~0.35us per-grid-step overhead negligible even at v7x's 3.2 TB/s.
_MAX_BLOCK_BYTES = 2 * 1024 * 1024


def _choose_tiles_3d(bh, seq_len, d, itemsize, per_stream_bytes):
    """Block (t heads, tl rows, d) for the d % 128 == 0 layout."""
    slice_bytes = seq_len * d * itemsize          # one full (1, L, d) head slice
    if slice_bytes > per_stream_bytes:
        # Long sequence: one head per block, tile length in sublane multiples.
        rows = (per_stream_bytes // (d * itemsize)) // _SUBLANES * _SUBLANES
        rows = max(_SUBLANES, rows)
        return 1, int(min(rows, seq_len))
    # Short sequence: fuse several (batch, head) slices per block.  No head
    # block halving here — it only helped 2-TC parts and hurt v5e/v6e.
    t = max(1, per_stream_bytes // slice_bytes)
    return int(min(t, bh)), int(seq_len)


def _choose_tiles_flat(bh, seq_len, d, itemsize, per_stream_bytes):
    """Block (t rows, cols) for the flattened (B*H, L*D) lane-dense layout."""
    total_cols = seq_len * d
    col_quantum = (_LANES // math.gcd(d, _LANES)) * d     # = lcm(d, 128)
    total_bytes = bh * total_cols * itemsize
    if total_bytes <= per_stream_bytes:
        return int(bh), int(total_cols)                   # single block
    row_span_bytes = total_cols * itemsize                # one (1, L*D) row
    if _SUBLANES * row_span_bytes <= per_stream_bytes:
        # Full columns (table loaded once per col block), tile rows by 8s.
        t = (per_stream_bytes // row_span_bytes) // _SUBLANES * _SUBLANES
        t = max(_SUBLANES, min(t, bh))
        return int(t), int(total_cols)
    # Long sequence: minimal rows, tile columns in 128-lane / d-group quanta.
    t = bh if bh < _SUBLANES else _SUBLANES
    cols = (per_stream_bytes // (t * itemsize)) // col_quantum * col_quantum
    cols = min(total_cols, max(col_quantum, cols))
    return int(t), int(cols)


def _rope_pallas(xs, cos, sin_signed, *, alias_inputs=False, per_stream_bytes=None):
    """Apply RoPE to each array in `xs` (all shaped (B*H, L, D), same dtype).

    `cos` is the usual cos table; `sin_signed` is sin with the rotate_half
    sign (-1 on the first half of D, +1 on the second) already folded in:
        out = x * cos + rotate_half_abs(x) * sin_signed
    """
    n = len(xs)
    bh, seq_len, d = xs[0].shape
    dtype = xs[0].dtype
    for x in xs:
        assert x.shape == (bh, seq_len, d) and x.dtype == dtype
    assert cos.shape == (seq_len, d) and sin_signed.shape == (seq_len, d)
    assert d % 2 == 0

    itemsize = jnp.dtype(dtype).itemsize
    half = d // 2

    # Budget-aware per-stream block size: n inputs + n outputs + 2 tables,
    # each double-buffered by the pipeline.
    n_streams = 2 * n + 2
    if per_stream_bytes is None:
        per_stream_bytes = min(_MAX_BLOCK_BYTES, _VMEM_BUDGET // (2 * n_streams))

    lane_dense = (d % _LANES == 0)

    if lane_dense:
        # Already lane-dense: keep (B*H, L, D), rotate along the full D axis.
        t, tl = _choose_tiles_3d(bh, seq_len, d, itemsize, per_stream_bytes)
        grid = (pl.cdiv(seq_len, tl), pl.cdiv(bh, t))      # heads innermost
        x_spec = pl.BlockSpec((t, tl, d), lambda j, i: (i, j, 0))
        tab_spec = pl.BlockSpec((tl, d), lambda j, i: (j, 0))
        x_args = tuple(xs)
        cos_arg, sin_arg = cos, sin_signed
        out_struct = jax.ShapeDtypeStruct((bh, seq_len, d), dtype)

        def kernel(*refs):
            in_refs, cos_ref, sin_ref = refs[:n], refs[n], refs[n + 1]
            out_refs = refs[n + 2:]
            c = cos_ref[...]                      # (tl, d)
            s = sin_ref[...]                      # (tl, d), sign folded in
            for x_ref, o_ref in zip(in_refs, out_refs):
                x = x_ref[...]                    # (t, tl, d)
                rot = jnp.concatenate([x[..., half:], x[..., :half]], axis=-1)
                o_ref[...] = x * c + rot * s
    else:
        # head_dim < 128 (or not a lane multiple): flatten L and D into the
        # lane axis so stores are unmasked (lane width = multiple of 128).
        total_cols = seq_len * d
        t, cols = _choose_tiles_flat(bh, seq_len, d, itemsize, per_stream_bytes)
        grid = (pl.cdiv(total_cols, cols), pl.cdiv(bh, t))  # rows innermost
        x_spec = pl.BlockSpec((t, cols), lambda j, i: (i, j))
        tab_spec = pl.BlockSpec((1, cols), lambda j, i: (0, j))
        x_args = tuple(x.reshape(bh, total_cols) for x in xs)   # free reshape
        cos_arg = cos.reshape(1, total_cols)
        sin_arg = sin_signed.reshape(1, total_cols)
        out_struct = jax.ShapeDtypeStruct((bh, total_cols), dtype)

        def kernel(*refs):
            in_refs, cos_ref, sin_ref = refs[:n], refs[n], refs[n + 1]
            out_refs = refs[n + 2:]
            c = cos_ref[...]                      # (1, cols)
            s = sin_ref[...]                      # (1, cols), sign folded in
            # Per-D-group rotate: out lane p takes x[p+half] in the first half
            # of its group and x[p-half] in the second half.  Column blocks
            # start on multiples of lcm(d,128), so groups are block-aligned.
            lane = jax.lax.broadcasted_iota(jnp.int32, (t, cols), 1)
            first_half = (lane % d) < half
            for x_ref, o_ref in zip(in_refs, out_refs):
                x = x_ref[...]                    # (t, cols)
                fwd = jnp.concatenate([x[..., half:], x[..., :half]], axis=-1)
                bwd = jnp.concatenate([x[..., -half:], x[..., :-half]], axis=-1)
                rot = jnp.where(first_half, fwd, bwd)
                o_ref[...] = x * c + rot * s

    total_elems = n * bh * seq_len * d
    cost = pl.CostEstimate(
        flops=4 * total_elems,
        transcendentals=0,
        bytes_accessed=2 * total_elems * itemsize + 2 * seq_len * d * itemsize,
    )

    outs = pl.pallas_call(
        kernel,
        out_shape=tuple(out_struct for _ in range(n)),
        grid_spec=pltpu.PrefetchScalarGridSpec(
            num_scalar_prefetch=0,
            grid=grid,
            in_specs=[x_spec] * n + [tab_spec, tab_spec],
            out_specs=tuple(x_spec for _ in range(n)),
        ),
        compiler_params=pltpu.CompilerParams(
            dimension_semantics=("parallel", "parallel"),
            vmem_limit_bytes=_VMEM_LIMIT,
        ),
        cost_estimate=cost,
        input_output_aliases={i: i for i in range(n)} if alias_inputs else {},
    )(*x_args, cos_arg, sin_arg)

    if not lane_dense:
        outs = tuple(o.reshape(bh, seq_len, d) for o in outs)
    return outs


class RotaryEmbedding:
    """JAX/Pallas port of the PyTorch RotaryEmbedding module (forward only)."""

    def __init__(self, dim_model: int, *_, **__):
        assert dim_model % 2 == 0, "dim_model must be even for RoPE"
        self.dim_model = dim_model
        # inv_freq = 1 / 10000^(arange(0, dim, 2) / dim), kept in float32.
        self.inv_freq = 1.0 / (
            10000.0 ** (jnp.arange(0, dim_model, 2, dtype=jnp.float32) / dim_model)
        )

    def _cos_sin_tables(self, seq_len: int, dtype):
        # Angles computed entirely in float32; only the final cos/sin are cast.
        t = jnp.arange(seq_len, dtype=jnp.float32)
        freqs = jnp.einsum("i,j->ij", t, self.inv_freq)           # (L, D/2) f32
        emb = jnp.concatenate([freqs, freqs], axis=-1)            # (L, D)
        half = self.dim_model // 2
        sign = jnp.concatenate(
            [-jnp.ones((half,), jnp.float32), jnp.ones((half,), jnp.float32)]
        )
        cos = jnp.cos(emb).astype(dtype)                          # (L, D)
        sin_signed = (jnp.sin(emb) * sign).astype(dtype)          # (L, D)
        return cos, sin_signed

    def __call__(self, q, k, *, donate_inputs=False):
        b, h, lq, d = q.shape
        lk = k.shape[-2]
        assert q.dtype == k.dtype, "q and k must share a dtype"
        assert d == self.dim_model and k.shape[-1] == self.dim_model
        assert lq <= lk, "q length must not exceed k length (tables use k)"

        # Tables derived from k's seq length (seq_dimension=-2), like PyTorch.
        cos, sin_signed = self._cos_sin_tables(lk, k.dtype)

        qf = q.reshape(b * h, lq, d)
        kf = k.reshape(k.shape[0] * k.shape[1], lk, d)

        if lq == lk and q.shape[:2] == k.shape[:2]:
            # Fused path: one pallas_call handles q and k with shared tables.
            q_out, k_out = _rope_pallas(
                (qf, kf), cos, sin_signed, alias_inputs=donate_inputs)
        else:
            # apply_rotary_pos_emb truncates the tables to each input's length.
            (q_out,) = _rope_pallas(
                (qf,), cos[:lq], sin_signed[:lq], alias_inputs=donate_inputs)
            (k_out,) = _rope_pallas(
                (kf,), cos, sin_signed, alias_inputs=donate_inputs)

        return q_out.reshape(q.shape), k_out.reshape(k.shape)


# ----------------------------- reference -----------------------------------


def _rotate_half_ref(x):
    half = x.shape[-1] // 2
    x1, x2 = x[..., :half], x[..., half:]
    return jnp.concatenate([-x2, x1], axis=-1)


def _reference(q, k, dim_model):
    inv_freq = 1.0 / (
        10000.0 ** (jnp.arange(0, dim_model, 2, dtype=jnp.float32) / dim_model)
    )
    seq_len = k.shape[-2]
    t = jnp.arange(seq_len, dtype=jnp.float32)
    freqs = jnp.einsum("i,j->ij", t, inv_freq)
    emb = jnp.concatenate([freqs, freqs], axis=-1)
    cos = jnp.cos(emb)[None, None, :, :].astype(q.dtype)
    sin = jnp.sin(emb)[None, None, :, :].astype(q.dtype)

    def apply(x):
        c = cos[:, :, : x.shape[-2], :]
        s = sin[:, :, : x.shape[-2], :]
        return x * c + _rotate_half_ref(x) * s

    return apply(q), apply(k)


if __name__ == "__main__":
    def _check(q_out, k_out, q, k, D):
        q_ref, k_ref = _reference(q, k, D)
        assert jnp.allclose(q_out, q_ref, atol=1e-5, rtol=1e-5), "q mismatch"
        assert jnp.allclose(k_out, k_ref, atol=1e-5, rtol=1e-5), "k mismatch"

    def _run_case(B, H, L, D, Lq=None):
        Lq = L if Lq is None else Lq
        key = jax.random.PRNGKey(0)
        kq, kk = jax.random.split(key)
        q = jax.random.normal(kq, (B, H, Lq, D), dtype=jnp.float32)
        k = jax.random.normal(kk, (B, H, L, D), dtype=jnp.float32)
        rope = RotaryEmbedding(dim_model=D)
        q_out, k_out = rope(q, k)
        jax.block_until_ready((q_out, k_out))
        _check(q_out, k_out, q, k, D)

    def _run_tiled_case(B, H, L, D, per_stream_bytes):
        # Exercise multi-block grids (index maps + edge-block masking) with a
        # deliberately tiny per-stream budget so shapes stay small.
        key = jax.random.PRNGKey(0)
        kq, kk = jax.random.split(key)
        q = jax.random.normal(kq, (B, H, L, D), dtype=jnp.float32)
        k = jax.random.normal(kk, (B, H, L, D), dtype=jnp.float32)
        rope = RotaryEmbedding(dim_model=D)
        cos, sin_signed = rope._cos_sin_tables(L, q.dtype)
        qf = q.reshape(B * H, L, D)
        kf = k.reshape(B * H, L, D)
        q_out, k_out = _rope_pallas(
            (qf, kf), cos, sin_signed, per_stream_bytes=per_stream_bytes)
        jax.block_until_ready((q_out, k_out))
        _check(q_out.reshape(q.shape), k_out.reshape(k.shape), q, k, D)

    # head_dim < 128: lane-dense flattened path (D fused into the lane dim).
    _run_case(B=2, H=4, L=8, D=32)
    # head_dim == 128: 3-D path (lane dim already dense).
    _run_case(B=2, H=4, L=128, D=128)
    # q shorter than k (tables built from k's length, truncated for q).
    _run_case(B=2, H=4, L=16, D=32, Lq=8)
    # odd head count / length that is not a lane multiple (full-dim blocks).
    _run_case(B=1, H=3, L=10, D=64)
    # multi-block grid with edge blocks, flattened (head_dim < 128) path.
    _run_tiled_case(B=2, H=8, L=20, D=32, per_stream_bytes=8 * 1024)
    # multi-block grid with edge blocks, 3-D (head_dim == 128) path.
    _run_tiled_case(B=2, H=4, L=24, D=128, per_stream_bytes=8 * 1024)

    print("KERNEL_OK")
</pallas_src>

<mosaic_0001>
module attributes {stable_mosaic.version = 11 : i64} {
  func.func @kernel(%arg0: i32, %arg1: i32, %arg2: memref<8x256xf32, #tpu.memory_space<vmem>>, %arg3: memref<8x256xf32, #tpu.memory_space<vmem>>, %arg4: memref<1x256xf32, #tpu.memory_space<vmem>>, %arg5: memref<1x256xf32, #tpu.memory_space<vmem>>, %arg6: memref<8x256xf32, #tpu.memory_space<vmem>>, %arg7: memref<8x256xf32, #tpu.memory_space<vmem>>) attributes {dimension_semantics = [#tpu.dimension_semantics<parallel>, #tpu.dimension_semantics<parallel>], iteration_bounds = array<i64: 1, 1>, scalar_prefetch = 0 : i64, scratch_operands = 0 : i64, tpu.core_type = #tpu.core_type<tc>, window_params = [{transform_indices = @transform_0, window_bounds = array<i64: 8, 256>}, {transform_indices = @transform_1, window_bounds = array<i64: 8, 256>}, {transform_indices = @transform_2, window_bounds = array<i64: 1, 256>}, {transform_indices = @transform_3, window_bounds = array<i64: 1, 256>}, {transform_indices = @transform_4, window_bounds = array<i64: 8, 256>}, {transform_indices = @transform_5, window_bounds = array<i64: 8, 256>}]} {
    %c0 = arith.constant 0 : index
    %c0_0 = arith.constant 0 : index
    %0 = vector.load %arg4[%c0, %c0_0] : memref<1x256xf32, #tpu.memory_space<vmem>>, vector<1x256xf32>
    %c0_1 = arith.constant 0 : index
    %c0_2 = arith.constant 0 : index
    %1 = vector.load %arg5[%c0_1, %c0_2] : memref<1x256xf32, #tpu.memory_space<vmem>>, vector<1x256xf32>
    %2 = tpu.iota {dimensions = array<i32: 1>} : vector<8x256xi32>
    %c32_i32 = arith.constant 32 : i32
    %c0_i32 = arith.constant 0 : i32
    %3 = arith.cmpi eq, %c32_i32, %c0_i32 : i32
    %c1_i32 = arith.constant 1 : i32
    %4 = arith.select %3, %c1_i32, %c32_i32 : i32
    %5 = vector.broadcast %4 : i32 to vector<8x256xi32>
    %6 = arith.remsi %2, %5 : vector<8x256xi32>
    %c0_i32_3 = arith.constant 0 : i32
    %7 = vector.broadcast %c0_i32_3 : i32 to vector<8x256xi32>
    %8 = arith.cmpi ne, %6, %7 : vector<8x256xi32>
    %c0_i32_4 = arith.constant 0 : i32
    %9 = vector.broadcast %c0_i32_4 : i32 to vector<8x256xi32>
    %10 = arith.cmpi slt, %6, %9 : vector<8x256xi32>
    %c0_i32_5 = arith.constant 0 : i32
    %11 = arith.cmpi slt, %4, %c0_i32_5 : i32
    %12 = vector.broadcast %11 : i1 to vector<8x256xi1>
    %13 = vector.broadcast %12 : vector<8x256xi1> to vector<8x256xi1>
    %14 = arith.xori %10, %13 : vector<8x256xi1>
    %15 = arith.andi %14, %8 : vector<8x256xi1>
    %16 = vector.broadcast %4 : i32 to vector<8x256xi32>
    %17 = arith.addi %6, %16 : vector<8x256xi32>
    %18 = arith.select %15, %17, %6 : vector<8x256xi1>, vector<8x256xi32>
    %c16_i32 = arith.constant 16 : i32
    %19 = vector.broadcast %c16_i32 : i32 to vector<8x256xi32>
    %20 = arith.cmpi slt, %18, %19 : vector<8x256xi32>
    %c0_6 = arith.constant 0 : index
    %c0_7 = arith.constant 0 : index
    %21 = vector.load %arg2[%c0_6, %c0_7] : memref<8x256xf32, #tpu.memory_space<vmem>>, vector<8x256xf32>
    %22 = vector.extract_strided_slice %21 {offsets = [0, 16], sizes = [8, 240], strides = [1, 1]} : vector<8x256xf32> to vector<8x240xf32>
    %23 = vector.extract_strided_slice %21 {offsets = [0, 0], sizes = [8, 16], strides = [1, 1]} : vector<8x256xf32> to vector<8x16xf32>
    %24 = tpu.concatenate %22, %23 in 1 : vector<8x240xf32>, vector<8x16xf32> -> vector<8x256xf32>
    %25 = vector.extract_strided_slice %21 {offsets = [0, 240], sizes = [8, 16], strides = [1, 1]} : vector<8x256xf32> to vector<8x16xf32>
    %26 = vector.extract_strided_slice %21 {offsets = [0, 0], sizes = [8, 240], strides = [1, 1]} : vector<8x256xf32> to vector<8x240xf32>
    %27 = tpu.concatenate %25, %26 in 1 : vector<8x16xf32>, vector<8x240xf32> -> vector<8x256xf32>
    %28 = arith.select %20, %24, %27 : vector<8x256xi1>, vector<8x256xf32>
    %29 = vector.broadcast %0 : vector<1x256xf32> to vector<8x256xf32>
    %30 = arith.mulf %21, %29 : vector<8x256xf32>
    %31 = vector.broadcast %1 : vector<1x256xf32> to vector<8x256xf32>
    %32 = arith.mulf %28, %31 : vector<8x256xf32>
    %33 = arith.addf %30, %32 : vector<8x256xf32>
    %c0_8 = arith.constant 0 : index
    %c0_9 = arith.constant 0 : index
    %34 = vector.load %arg6[%c0_8, %c0_9] : memref<8x256xf32, #tpu.memory_space<vmem>>, vector<8x256xf32>
    tpu.vector_store %arg6[%c0_8, %c0_9], %33 {strides = array<i32>} : memref<8x256xf32, #tpu.memory_space<vmem>>, vector<8x256xf32>,
    %c0_10 = arith.constant 0 : index
    %c0_11 = arith.constant 0 : index
    %35 = vector.load %arg3[%c0_10, %c0_11] : memref<8x256xf32, #tpu.memory_space<vmem>>, vector<8x256xf32>
    %36 = vector.extract_strided_slice %35 {offsets = [0, 16], sizes = [8, 240], strides = [1, 1]} : vector<8x256xf32> to vector<8x240xf32>
    %37 = vector.extract_strided_slice %35 {offsets = [0, 0], sizes = [8, 16], strides = [1, 1]} : vector<8x256xf32> to vector<8x16xf32>
    %38 = tpu.concatenate %36, %37 in 1 : vector<8x240xf32>, vector<8x16xf32> -> vector<8x256xf32>
    %39 = vector.extract_strided_slice %35 {offsets = [0, 240], sizes = [8, 16], strides = [1, 1]} : vector<8x256xf32> to vector<8x16xf32>
    %40 = vector.extract_strided_slice %35 {offsets = [0, 0], sizes = [8, 240], strides = [1, 1]} : vector<8x256xf32> to vector<8x240xf32>
    %41 = tpu.concatenate %39, %40 in 1 : vector<8x16xf32>, vector<8x240xf32> -> vector<8x256xf32>
    %42 = arith.select %20, %38, %41 : vector<8x256xi1>, vector<8x256xf32>
    %43 = vector.broadcast %0 : vector<1x256xf32> to vector<8x256xf32>
    %44 = arith.mulf %35, %43 : vector<8x256xf32>
    %45 = vector.broadcast %1 : vector<1x256xf32> to vector<8x256xf32>
    %46 = arith.mulf %42, %45 : vector<8x256xf32>
    %47 = arith.addf %44, %46 : vector<8x256xf32>
    %c0_12 = arith.constant 0 : index
    %c0_13 = arith.constant 0 : index
    %48 = vector.load %arg7[%c0_12, %c0_13] : memref<8x256xf32, #tpu.memory_space<vmem>>, vector<8x256xf32>
    tpu.vector_store %arg7[%c0_12, %c0_13], %47 {strides = array<i32>} : memref<8x256xf32, #tpu.memory_space<vmem>>, vector<8x256xf32>,
    return
  }
  func.func @transform_0(%arg0: i32, %arg1: i32) -> (i32, i32) {
    %c0_i32 = arith.constant 0 : i32
    return %arg1, %arg0 : i32, i32
  }
  func.func @transform_1(%arg0: i32, %arg1: i32) -> (i32, i32) {
    %c0_i32 = arith.constant 0 : i32
    return %arg1, %arg0 : i32, i32
  }
  func.func @transform_2(%arg0: i32, %arg1: i32) -> (i32, i32) {
    %c0_i32 = arith.constant 0 : i32
    %c0_i32_0 = arith.constant 0 : i32
    return %c0_i32, %arg0 : i32, i32
  }
  func.func @transform_3(%arg0: i32, %arg1: i32) -> (i32, i32) {
    %c0_i32 = arith.constant 0 : i32
    %c0_i32_0 = arith.constant 0 : i32
    return %c0_i32, %arg0 : i32, i32
  }
  func.func @transform_4(%arg0: i32, %arg1: i32) -> (i32, i32) {
    %c0_i32 = arith.constant 0 : i32
    return %arg1, %arg0 : i32, i32
  }
  func.func @transform_5(%arg0: i32, %arg1: i32) -> (i32, i32) {
    %c0_i32 = arith.constant 0 : i32
    return %arg1, %arg0 : i32, i32
  }
}

</mosaic_0001>

<bundles_post_ra>
// kernel: tpu_custom_call.1
= control target key start
LH: loop header
LB: loop body
LE: loop exit
PB: predicated region body
PF: predicated region fallthrough
CT: control target
= control target key end

     0   :  { %11 = vsyncpa [#allocation3], 0  ;;  %s417_s0 = inlined_call_operand.hbm [shape: f32[8,256], index: 0, kind: input, shape index: {}]   ;;  %s418_s1 = inlined_call_operand.hbm [shape: f32[8,256], index: 1, kind: input, shape index: {}]   ;;  %s419_s2 = inlined_call_operand.hbm [shape: f32[1,256], index: 2, kind: input, shape index: {}]   ;;  %s420_s3 = inlined_call_operand.vmem [shape: f32[1,256], index: 3, kind: input, shape index: {}]   ;;  %s421_s4 = inlined_call_operand.hbm [shape: f32[8,256], index: 4, kind: output, shape index: {0}]   ;;  %s422_s5 = inlined_call_operand.hbm [shape: f32[8,256], index: 5, kind: output, shape index: {1}]  }
   0x1   :  { %12 = vsyncpa [#allocation6], 0 }
   0x2   :  { %13 = vsyncpa [#allocation4], 0  ;;  %s31_s20 = sshll.u32 %s418_s1, 4  ;;  %s32_s20 = int_to_ptr.hbm [resolvable:$true] %s31_s20 }
   0x3   :  { %14 = vsyncpa [#allocation10], 0  ;;  %s338_s21 = smov [#allocation5]   ;;  %s20_s25 = sshll.u32 %s417_s0, 4  ;;  %s21_s25 = int_to_ptr.hbm [resolvable:$true] %s20_s25 }
   0x4   :  { %s33_s22 = sshll.u32 %s338_s21, 4  ;;  %s339_s26 = smov [#allocation2]   ;;  %s34_s22 = int_to_ptr.vmem [resolvable:$true] %s33_s22 }
   0x5   :  { %36 = dma.hbm_to_vmem [thread:$0]  %s32_s20, 256, %s34_s22, [#allocation6]  }
   0x6   :  { %s22_s27 = sshll.u32 %s339_s26, 4  ;;  %s42_s30 = sshll.u32 %s419_s2, 4  ;;  %s23_s27 = int_to_ptr.vmem [resolvable:$true] %s22_s27  ;;  %s43_s30 = int_to_ptr.hbm [resolvable:$true] %s42_s30 }
   0x7   :  { %25 = dma.hbm_to_vmem [thread:$0]  %s21_s25, 256, %s23_s27, [#allocation3]  }
   0x8   :  { %s340_s1 = smov [#allocation7]  }
   0x9   :  { %s44_s6 = sshll.u32 %s340_s1, 4  ;;  %s45_s6 = int_to_ptr.vmem [resolvable:$true] %s44_s6 }
   0xa   :  { %47 = dma.hbm_to_vmem [thread:$0]  %s43_s30, 32, %s45_s6, [#allocation6]  }
   0xb   :  { %330 = dma.done.wait [#allocation3], 256  }
   0xc   :  { %331 = vsyncadd [#allocation3], 4294967040 }
   0xd   :  { %332 = dma.done.wait [#allocation6], 288  }
   0xe   :  { %333 = vsyncadd [#allocation6], 4294967008  ;;  %v94_v0 = vld [vmem:[#allocation2 + $0x8] sm:$0xff]  ;;  %v93_v1 = vld [vmem:[#allocation2] sm:$0xff]  ;;  %s341_s0 = smov 16   ;;  %s342_s7 = smov 112   ;;  %v64_v4 = vlaneseq }
   0xf   :  { %107 = vrot.lane.b32.xlu1 %v94_v0, %s341_s0  ;;  %97 = vrot.lane.b32.xlu0 %v93_v1, %s342_s7  ;;  %v137_v2 = vld [vmem:[#allocation5] sm:$0xff]  ;;  %v138_v3 = vld [vmem:[#allocation5 + $0x8] sm:$0xff]  ;;  %v62_v9 = vld [vmem:[#allocation7] sm:$0x3]  ;;  %vm101_vm0 = vcmask 916480   ;;  %vm112_vm1 = vcmask 130048  }
  0x10   :  { %141 = vrot.lane.b32.xlu2 %v137_v2, %s342_s7  ;;  %v65_v5 = vand.u32 127, %v64_v4  ;;  %v121_v12 = vperm.slane %v62_v9, 1  ;;  %v120_v13 = vperm.slane %v62_v9, 0  ;;  %v63_v15 = vld [vmem:[%s420_s3] sm:$0x3]  ;;  %s343_s3 = smov [#allocation8]  }
  0x11   :  { %v127_v18 = vperm.slane %v63_v15, 0  ;;  %v128_v19 = vperm.slane %v63_v15, 1  ;;  %s174_s9 = sshll.u32 %s343_s3, 4  ;;  %s176_s12 = sshll.u32 %s421_s4, 4  ;;  %s175_s9 = int_to_ptr.vmem [resolvable:$true] %s174_s9  ;;  %s177_s12 = int_to_ptr.hbm [resolvable:$true] %s176_s12 }
  0x12   :  { %v66_v6 = vadd.s32 128, %v65_v5  ;;  %v71_v10 = vand.u32 31, %v65_v5  ;;  %v125_v20 = vmul.f32 %v121_v12, %v94_v0  ;;  %v124_v21 = vmul.f32 %v120_v13, %v93_v1  ;;  %s344_s4 = smov [#allocation9]   ;;  %s187_s16 = sshll.u32 %s422_s5, 4  ;;  %s188_s16 = int_to_ptr.hbm [resolvable:$true] %s187_s16 }
  0x13   :  { %v161_v35 = vmul.f32 %v137_v2, %v120_v13  ;;  %v162_v36 = vmul.f32 %v138_v3, %v121_v12  ;;  %s185_s13 = sshll.u32 %s344_s4, 4  ;;  %s186_s13 = int_to_ptr.vmem [resolvable:$true] %s185_s13 }
  0x14   :  { %v78_v11 = vand.u32 31, %v66_v6  ;;  %vm387_vm2 = vcmp.lt.s32.totalorder %v71_v10, 16 }
  0x16   :  { %vm391_vm3 = vcmp.lt.s32.totalorder %v78_v11, 16 }
  0x17   :  { %110 = vrot.lane.b32.xlu1 %v93_v1, %s341_s0  ;;  %99 = vrot.lane.b32.xlu0 %v94_v0, %s342_s7 }
  0x18   :  { %143 = vrot.lane.b32.xlu2 %v138_v3, %s342_s7 }
  0x1f   :  { %153 = vrot.lane.b32.xlu1 %v137_v2, %s341_s0  ;;  %150 = vrot.lane.b32.xlu0 %v138_v3, %s341_s0 }
  0x6a   :  { %v142_v14 = vpop.permute.xlu2 %141 }
  0x72   :  { %v144_v34 = vpop.permute.xlu2 %143 }
  0x73   :  { %v145_v39 = vsel %vm101_vm0, %v142_v14, %v144_v34  ;;  %v149_v40 = vsel %vm101_vm0, %v144_v34, %v142_v14 }
  0x81   :  { %v108_v7 = vpop.permute.xlu1 %107  ;;  %v98_v8 = vpop.permute.xlu0 %97 }
  0x89   :  { %v111_v22 = vpop.permute.xlu1 %110  ;;  %v100_v23 = vpop.permute.xlu0 %99 }
  0x8a   :  { %v113_v24 = vsel %vm112_vm1, %v111_v22, %v108_v7  ;;  %v116_v25 = vsel %vm112_vm1, %v108_v7, %v111_v22  ;;  %v102_v26 = vsel %vm101_vm0, %v98_v8, %v100_v23  ;;  %v106_v27 = vsel %vm101_vm0, %v100_v23, %v98_v8 }
  0x8b   :  { %v117_v28 = vsel %vm387_vm2, %v102_v26, %v116_v25  ;;  %v118_v29 = vsel %vm391_vm3, %v106_v27, %v113_v24 }
  0x8c   :  { %v131_v30 = vmul.f32 %v127_v18, %v117_v28  ;;  %v132_v31 = vmul.f32 %v128_v19, %v118_v29 }
  0x8e   :  { %v133_v32 = vadd.f32 %v131_v30, %v124_v21  ;;  %v134_v33 = vadd.f32 %v132_v31, %v125_v20 }
  0x90   :  { %135 = vst [vmem:[#allocation8] sm:$0xff] %v133_v32 }
  0x91   :  { %136 = vst [vmem:[#allocation8 + $0x8] sm:$0xff] %v134_v33  ;;  %v154_v37 = vpop.permute.xlu1 %153  ;;  %v151_v38 = vpop.permute.xlu0 %150 }
  0x92   :  { %v155_v41 = vsel %vm112_vm1, %v154_v37, %v151_v38  ;;  %v158_v42 = vsel %vm112_vm1, %v151_v38, %v154_v37  ;;  %179 = dma.vmem_to_hbm [thread:$0]  %s175_s9, 256, %s177_s12, [#allocation4]  }
  0x93   :  { %v159_v43 = vsel %vm387_vm2, %v145_v39, %v158_v42  ;;  %v160_v44 = vsel %vm391_vm3, %v149_v40, %v155_v41 }
  0x94   :  { %v163_v45 = vmul.f32 %v159_v43, %v127_v18  ;;  %v164_v46 = vmul.f32 %v160_v44, %v128_v19 }
  0x96   :  { %v165_v47 = vadd.f32 %v163_v45, %v161_v35  ;;  %v166_v48 = vadd.f32 %v164_v46, %v162_v36 }
  0x98   :  { %167 = vst [vmem:[#allocation9] sm:$0xff] %v165_v47 }
  0x99   :  { %168 = vst [vmem:[#allocation9 + $0x8] sm:$0xff] %v166_v48 }
  0x9a   :  { %190 = dma.vmem_to_hbm [thread:$0]  %s186_s13, 256, %s188_s16, [#allocation10]  }
  0x9b   :  { %334 = dma.done.wait [#allocation4], 256  }
  0x9c   :  { %335 = vsyncadd [#allocation4], 4294967040 }
  0x9d   :  { %336 = dma.done.wait [#allocation10], 256  }
  0x9e   :  { %337 = vsyncadd [#allocation10], 4294967040 }
  0x9f   :  { %199 = vsyncpa [#allocation3], 1 }
  0xa0   :  { %200 = vsyncpa [#allocation6], 1 }
  0xa1   :  { %201 = vsyncpa [#allocation4], 1 }
  0xa2   :  { %202 = vsyncpa [#allocation10], 1 }

</bundles_post_ra>
